<compile_context>
chip_gen: v7x
topology: tpu7x:2x2x1
jax: 0.10.0
libtpu: 0.0.40
codegen_flags: <defaults>
</compile_context>

<pallas_src>
import functools

import jax
import jax.numpy as jnp
from jax.experimental import pallas as pl
from jax.experimental.pallas import tpu as pltpu


_TM_CAP = 512                       # max rows per conv M tile
_VMEM_TILE_BUDGET = 12 * 1024 * 1024  # double-buffered cols+weights budget for single-K-step path


def _round_up(x, m):
    return ((x + m - 1) // m) * m


def _cdiv(a, b):
    return -(-a // b)


# ---------------------------------------------------------------------------
# Pallas kernels
# ---------------------------------------------------------------------------
def _conv_bias_relu_kernel(cols_ref, w_ref, b_ref, o_ref):
    """Single-K-step bf16 matmul, f32 accumulate on the MXU, fused bias + ReLU, bf16 store."""
    acc = jnp.dot(cols_ref[...], w_ref[...], preferred_element_type=jnp.float32)
    o_ref[...] = jnp.maximum(acc + b_ref[...], 0.0).astype(o_ref.dtype)


def _masked_stats(acc, m_true):
    """Per-channel partial sum / sum-of-squares over valid rows of this M tile (f32)."""
    tm = acc.shape[0]
    row = jax.lax.broadcasted_iota(jnp.int32, acc.shape, 0) + pl.program_id(0) * tm
    accv = jnp.where(row < m_true, acc, 0.0)
    s = jnp.sum(accv, axis=0, keepdims=True)
    ssq = jnp.sum(accv * accv, axis=0, keepdims=True)
    return s, ssq


def _conv_stats_kernel(m_true, cols_ref, w_ref, o_ref, sum_ref, ssq_ref):
    """Single-K-step matmul (no bias: train-mode BN cancels it).  Epilogue emits per-channel
    partial sum / sum-of-squares for this M tile so BN stats need no extra HBM pass."""
    acc = jnp.dot(cols_ref[...], w_ref[...], preferred_element_type=jnp.float32)
    o_ref[...] = acc.astype(o_ref.dtype)
    s, ssq = _masked_stats(acc, m_true)
    sum_ref[...] = s.reshape(sum_ref.shape)
    ssq_ref[...] = ssq.reshape(ssq_ref.shape)


def _conv_bias_relu_kernel_ktiled(cols_ref, w_ref, b_ref, o_ref, acc_ref):
    """Fallback for very large K: K-tiled matmul with f32 VMEM accumulator."""
    k = pl.program_id(2)

    @pl.when(k == 0)
    def _():
        acc_ref[...] = jnp.zeros_like(acc_ref)

    acc_ref[...] += jnp.dot(cols_ref[...], w_ref[...], preferred_element_type=jnp.float32)

    @pl.when(k == pl.num_programs(2) - 1)
    def _():
        o_ref[...] = jnp.maximum(acc_ref[...] + b_ref[...], 0.0).astype(o_ref.dtype)


def _conv_stats_kernel_ktiled(m_true, cols_ref, w_ref, o_ref, sum_ref, ssq_ref, acc_ref):
    k = pl.program_id(2)

    @pl.when(k == 0)
    def _():
        acc_ref[...] = jnp.zeros_like(acc_ref)

    acc_ref[...] += jnp.dot(cols_ref[...], w_ref[...], preferred_element_type=jnp.float32)

    @pl.when(k == pl.num_programs(2) - 1)
    def _():
        acc = acc_ref[...]
        o_ref[...] = acc.astype(o_ref.dtype)
        s, ssq = _masked_stats(acc, m_true)
        sum_ref[...] = s.reshape(sum_ref.shape)
        ssq_ref[...] = ssq.reshape(ssq_ref.shape)


def _bn_relu_apply_kernel(x_ref, scale_ref, shift_ref, o_ref):
    """y = relu(x * scale + shift) with per-channel (1, C) scale/shift; f32 math, bf16 in/out."""
    x = x_ref[...].astype(jnp.float32)
    o_ref[...] = jnp.maximum(x * scale_ref[...] + shift_ref[...], 0.0).astype(o_ref.dtype)


# ---------------------------------------------------------------------------
# Tiling helpers (static, shape-only)
# ---------------------------------------------------------------------------
def _pick_tc(cout):
    """Output-channel tile: 256 on 256-wide-MXU chips (v6e/v7x) when it adds no extra padding."""
    c_pad128 = _round_up(cout, 128)
    if c_pad128 % 256 == 0:
        try:
            kind = jax.devices()[0].device_kind.lower()
        except Exception:
            kind = ""
        if "v5" not in kind:
            return 256
    return 128


def _plan_k(K, tc):
    """Return (k_pad, tk, n_k).  Single K step (no accumulator) whenever double-buffered
    cols + weight tiles fit the VMEM budget; otherwise tile K with zero padding."""
    single_bytes = 2 * (_TM_CAP * K * 2) + 2 * (K * tc * 2)
    if single_bytes <= _VMEM_TILE_BUDGET:
        return K, K, 1
    tk = 1024
    k_pad = _round_up(K, tk)
    return k_pad, tk, k_pad // tk


def _pick_m_tiling(M, n_c):
    """Row tile; guarantees >= 2 parallel output blocks when possible (dual-TC v7x)."""
    if M <= _TM_CAP:
        if n_c == 1 and M >= 16:
            tm = _round_up(_cdiv(M, 2), 8)
        else:
            tm = M
    else:
        tm = _TM_CAP
    return tm, _cdiv(M, tm)


# ---------------------------------------------------------------------------
# Wrappers
# ---------------------------------------------------------------------------
def _im2col_nhwc(x_nhwc, ks, padding, cin_pad):
    """(N,H,W,Cin) bf16 -> ((N*Ho*Wo, ks*ks*cin_pad), Ho, Wo); stride=1, zero padding.
    Channel padding to cin_pad (multiple of 8) is folded into the same pad op.
    K ordering is (dy, dx, cin), matching the weight layout prepared in _prepare_block."""
    N, H, W, Cin = x_nhwc.shape
    Ho = H + 2 * padding - ks + 1
    Wo = W + 2 * padding - ks + 1
    xp = jnp.pad(x_nhwc, ((0, 0), (padding, padding), (padding, padding), (0, cin_pad - Cin)))
    patches = [xp[:, dy:dy + Ho, dx:dx + Wo, :] for dy in range(ks) for dx in range(ks)]
    cols = jnp.stack(patches, axis=3)                      # (N, Ho, Wo, ks*ks, cin_pad)
    return cols.reshape(N * Ho * Wo, ks * ks * cin_pad), Ho, Wo


def _prepare_block(w, b, gamma, beta):
    """One-time weight/bias/BN-parameter layout + padding + bf16 cast (hoisted out of forward)."""
    cout, cin, kh, kw = w.shape
    cin_pad = _round_up(cin, 8)
    K = kh * kw * cin_pad
    tc = _pick_tc(cout)
    c_pad = _round_up(cout, tc)
    k_pad, tk, n_k = _plan_k(K, tc)

    w_p = jnp.pad(w, ((0, 0), (0, cin_pad - cin), (0, 0), (0, 0)))
    w_mat = jnp.transpose(w_p, (2, 3, 1, 0)).reshape(K, cout).astype(jnp.bfloat16)
    w_mat = jnp.pad(w_mat, ((0, k_pad - K), (0, c_pad - cout)))
    b_row = jnp.pad(b.astype(jnp.float32), (0, c_pad - cout)).reshape(1, c_pad)
    gamma_p = jnp.pad(gamma.astype(jnp.float32), (0, c_pad - cout))
    beta_p = jnp.pad(beta.astype(jnp.float32), (0, c_pad - cout))
    return dict(cout=cout, cin=cin, cin_pad=cin_pad, K=K, k_pad=k_pad, tk=tk, n_k=n_k,
                tc=tc, c_pad=c_pad, w_mat=w_mat, b_row=b_row, gamma=gamma_p, beta=beta_p)


def _conv2d_pallas(cols, blk, *, with_bn_stats):
    """3x3 stride-1 conv as a tiled Pallas matmul over the im2col matrix.
    Returns bf16 (M, c_pad) output (+ f32 per-M-tile BN partial sums when with_bn_stats)."""
    M, K = cols.shape
    tc, c_pad = blk["tc"], blk["c_pad"]
    tk, k_pad, n_k = blk["tk"], blk["k_pad"], blk["n_k"]
    n_c = c_pad // tc
    tm, n_m = _pick_m_tiling(M, n_c)
    w_mat, b_row = blk["w_mat"], blk["b_row"]

    if n_k == 1:
        grid = (n_m, n_c)
        cols_spec = pl.BlockSpec((tm, K), lambda i, j: (i, 0))
        w_spec = pl.BlockSpec((K, tc), lambda i, j: (0, j))
        b_spec = pl.BlockSpec((1, tc), lambda i, j: (0, j))
        out_spec = pl.BlockSpec((tm, tc), lambda i, j: (i, j))
        sum_spec = pl.BlockSpec((1, 1, tc), lambda i, j: (i, 0, j))
        ssq_spec = pl.BlockSpec((1, 1, tc), lambda i, j: (i, 0, j))
        scratch = ()
        sem = ("parallel", "parallel")
        bias_kernel = _conv_bias_relu_kernel
        stats_kernel = functools.partial(_conv_stats_kernel, M)
    else:
        # Rare fallback for very large Cin: zero-pad K and accumulate across K tiles.
        cols = jnp.pad(cols, ((0, 0), (0, k_pad - K)))
        grid = (n_m, n_c, n_k)
        cols_spec = pl.BlockSpec((tm, tk), lambda i, j, k: (i, k))
        w_spec = pl.BlockSpec((tk, tc), lambda i, j, k: (k, j))
        b_spec = pl.BlockSpec((1, tc), lambda i, j, k: (0, j))
        out_spec = pl.BlockSpec((tm, tc), lambda i, j, k: (i, j))
        sum_spec = pl.BlockSpec((1, 1, tc), lambda i, j, k: (i, 0, j))
        ssq_spec = pl.BlockSpec((1, 1, tc), lambda i, j, k: (i, 0, j))
        scratch = (pltpu.VMEM((tm, tc), jnp.float32),)
        sem = ("parallel", "parallel", "arbitrary")
        bias_kernel = _conv_bias_relu_kernel_ktiled
        stats_kernel = functools.partial(_conv_stats_kernel_ktiled, M)

    cparams = pltpu.CompilerParams(dimension_semantics=sem,
                                   vmem_limit_bytes=32 * 1024 * 1024)

    if with_bn_stats:
        return pl.pallas_call(
            stats_kernel,
            out_shape=(jax.ShapeDtypeStruct((M, c_pad), jnp.bfloat16),
                       jax.ShapeDtypeStruct((n_m, 1, c_pad), jnp.float32),
                       jax.ShapeDtypeStruct((n_m, 1, c_pad), jnp.float32)),
            grid_spec=pltpu.PrefetchScalarGridSpec(
                num_scalar_prefetch=0, grid=grid,
                in_specs=[cols_spec, w_spec],
                out_specs=[out_spec, sum_spec, ssq_spec],
                scratch_shapes=scratch),
            compiler_params=cparams,
        )(cols, w_mat)
    else:
        return pl.pallas_call(
            bias_kernel,
            out_shape=jax.ShapeDtypeStruct((M, c_pad), jnp.bfloat16),
            grid_spec=pltpu.PrefetchScalarGridSpec(
                num_scalar_prefetch=0, grid=grid,
                in_specs=[cols_spec, w_spec, b_spec],
                out_specs=out_spec,
                scratch_shapes=scratch),
            compiler_params=cparams,
        )(cols, w_mat, b_row)


def _bn_finalize(psum, pssq, gamma_p, beta_p, m_true, eps=1e-5):
    """Train-mode BN batch stats from per-tile partials (tiny, plain JAX).  Biased variance,
    matching PyTorch's forward normalization."""
    s1 = jnp.sum(psum[:, 0, :], axis=0)
    s2 = jnp.sum(pssq[:, 0, :], axis=0)
    mean = s1 / m_true
    var = jnp.maximum(s2 / m_true - mean * mean, 0.0)
    scale = gamma_p * jax.lax.rsqrt(var + eps)
    shift = beta_p - mean * scale
    return scale, shift


def _bn_relu_pallas(x2d, scale, shift):
    """Standalone normalize+ReLU (final block only): bf16 in/out, large row tiles."""
    M, c_pad = x2d.shape
    row_cap = int(min(2048, max(256, (4 * 1024 * 1024) // (2 * c_pad))))
    if M <= row_cap:
        tm = _round_up(_cdiv(M, 2), 8) if M >= 16 else M   # >=2 parallel blocks when possible
    else:
        tm = (row_cap // 8) * 8
    n_m = _cdiv(M, tm)
    return pl.pallas_call(
        _bn_relu_apply_kernel,
        out_shape=jax.ShapeDtypeStruct((M, c_pad), jnp.bfloat16),
        grid_spec=pltpu.PrefetchScalarGridSpec(
            num_scalar_prefetch=0, grid=(n_m,),
            in_specs=[pl.BlockSpec((tm, c_pad), lambda i: (i, 0)),
                      pl.BlockSpec((1, c_pad), lambda i: (0, 0)),
                      pl.BlockSpec((1, c_pad), lambda i: (0, 0))],
            out_specs=pl.BlockSpec((tm, c_pad), lambda i: (i, 0))),
        compiler_params=pltpu.CompilerParams(dimension_semantics=("parallel",),
                                             vmem_limit_bytes=32 * 1024 * 1024),
    )(x2d, scale.reshape(1, c_pad), shift.reshape(1, c_pad))


class UnetConv2Pallas:
    """JAX/Pallas equivalent of unetConv2 (kaiming-normal conv weights, BN gamma~N(1,0.02))."""

    def __init__(self, key, in_size, out_size, is_batchnorm=True, n=2, ks=3, stride=1, padding=1):
        assert stride == 1, "only stride=1 implemented (matches default unetConv2 usage)"
        self.n = n
        self.ks = ks
        self.padding = padding
        self.is_batchnorm = is_batchnorm
        self.raw_params = []
        self.blocks = []
        cin = in_size
        for _ in range(n):
            key, kwk, kbk, kgk = jax.random.split(key, 4)
            fan_in = cin * ks * ks
            # kaiming_normal_(a=0, mode='fan_in'): std = sqrt(2 / fan_in)
            w = jax.random.normal(kwk, (out_size, cin, ks, ks), jnp.float32) * jnp.sqrt(2.0 / fan_in)
            bound = 1.0 / (fan_in ** 0.5)
            b = jax.random.uniform(kbk, (out_size,), jnp.float32, -bound, bound)
            gamma = 1.0 + 0.02 * jax.random.normal(kgk, (out_size,), jnp.float32)
            beta = jnp.zeros((out_size,), jnp.float32)
            self.raw_params.append((w, b, gamma, beta))
            self.blocks.append(_prepare_block(w, b, gamma, beta))
            cin = out_size
        self._forward = jax.jit(self._forward_impl)

    def _forward_impl(self, x_nchw):
        x = jnp.transpose(x_nchw, (0, 2, 3, 1)).astype(jnp.bfloat16)   # NCHW -> NHWC, bf16 activations
        N = x.shape[0]
        pending = None   # (scale, shift) of previous block's BN, fused into the next im2col
        for bi, blk in enumerate(self.blocks):
            if pending is not None:
                scale_b, shift_b = pending
                x = jnp.maximum(x.astype(jnp.float32) * scale_b + shift_b, 0.0).astype(jnp.bfloat16)
                pending = None
            cols, Ho, Wo = _im2col_nhwc(x, self.ks, self.padding, blk["cin_pad"])
            M = cols.shape[0]
            cout = blk["cout"]
            if self.is_batchnorm:
                out2d, psum, pssq = _conv2d_pallas(cols, blk, with_bn_stats=True)
                scale_c, shift_c = _bn_finalize(psum, pssq, blk["gamma"], blk["beta"], M)
                if bi == self.n - 1:
                    out2d = _bn_relu_pallas(out2d, scale_c, shift_c)
                else:
                    pending = (scale_c[:cout].reshape(1, 1, 1, cout),
                               shift_c[:cout].reshape(1, 1, 1, cout))
            else:
                out2d = _conv2d_pallas(cols, blk, with_bn_stats=False)
            x = out2d[:, :cout].reshape(N, Ho, Wo, cout)               # strip channel padding
        return jnp.transpose(x, (0, 3, 1, 2)).astype(jnp.float32)      # NHWC -> NCHW, f32 output

    def __call__(self, x_nchw):
        return self._forward(x_nchw)


# ---------------------------------------------------------------------------
# Pure-JAX reference (matches PyTorch forward semantics) for a loose numeric check
# ---------------------------------------------------------------------------
def _reference_forward(x_nchw, raw_params, is_batchnorm, padding, eps=1e-5):
    x = x_nchw.astype(jnp.float32)
    for (w, b, gamma, beta) in raw_params:
        x = jax.lax.conv_general_dilated(
            x, w, window_strides=(1, 1),
            padding=((padding, padding), (padding, padding)),
            dimension_numbers=("NCHW", "OIHW", "NCHW"))
        x = x + b.reshape(1, -1, 1, 1)
        if is_batchnorm:
            mean = jnp.mean(x, axis=(0, 2, 3), keepdims=True)
            var = jnp.mean((x - mean) ** 2, axis=(0, 2, 3), keepdims=True)
            x = (x - mean) * jax.lax.rsqrt(var + eps)
            x = x * gamma.reshape(1, -1, 1, 1) + beta.reshape(1, -1, 1, 1)
        x = jnp.maximum(x, 0.0)
    return x


if __name__ == "__main__":
    key = jax.random.PRNGKey(0)
    k_in, k_mod = jax.random.split(key)

    # Small shapes: batch=2, in_channels=4, out_channels=8, spatial=16x16 (NCHW like PyTorch)
    x = jax.random.normal(k_in, (2, 4, 16, 16), jnp.float32)

    # BatchNorm path (default unetConv2 configuration)
    module_bn = UnetConv2Pallas(k_mod, in_size=4, out_size=8, is_batchnorm=True,
                                n=2, ks=3, stride=1, padding=1)
    out_bn = jax.block_until_ready(module_bn(x))
    assert out_bn.shape == (2, 8, 16, 16), out_bn.shape
    assert bool(jnp.all(jnp.isfinite(out_bn)))
    ref_bn = _reference_forward(x, module_bn.raw_params, True, 1)
    err_bn = float(jnp.max(jnp.abs(out_bn - ref_bn)))
    assert err_bn < 0.25, f"BN path max abs err {err_bn}"

    # No-BN path (Conv -> bias -> ReLU fused in the matmul epilogue)
    module_nobn = UnetConv2Pallas(k_mod, in_size=4, out_size=8, is_batchnorm=False,
                                  n=2, ks=3, stride=1, padding=1)
    out_nobn = jax.block_until_ready(module_nobn(x))
    assert out_nobn.shape == (2, 8, 16, 16), out_nobn.shape
    assert bool(jnp.all(jnp.isfinite(out_nobn)))
    ref_nobn = _reference_forward(x, module_nobn.raw_params, False, 1)
    err_nobn = float(jnp.max(jnp.abs(out_nobn - ref_nobn)))
    assert err_nobn < 0.25, f"no-BN path max abs err {err_nobn}"

    print("KERNEL_OK")
</pallas_src>

<mosaic_0001>
module attributes {stable_mosaic.version = 11 : i64} {
  func.func @_conv_stats_kernel(%arg0: i32, %arg1: i32, %arg2: memref<256x72xbf16, #tpu.memory_space<vmem>>, %arg3: memref<72x128xbf16, #tpu.memory_space<vmem>>, %arg4: memref<256x128xbf16, #tpu.memory_space<vmem>>, %arg5: memref<1x1x128xf32, #tpu.memory_space<vmem>>, %arg6: memref<1x1x128xf32, #tpu.memory_space<vmem>>) attributes {dimension_semantics = [#tpu.dimension_semantics<parallel>, #tpu.dimension_semantics<parallel>], iteration_bounds = array<i64: 2, 1>, scalar_prefetch = 0 : i64, scratch_operands = 0 : i64, tpu.core_type = #tpu.core_type<tc>, window_params = [{transform_indices = @transform_0, window_bounds = array<i64: 256, 72>}, {transform_indices = @transform_1, window_bounds = array<i64: 72, 128>}, {transform_indices = @transform_2, window_bounds = array<i64: 256, 128>}, {transform_indices = @transform_3, window_bounds = array<i64: 1, 1, 128>}, {transform_indices = @transform_4, window_bounds = array<i64: 1, 1, 128>}]} {
    %c0 = arith.constant 0 : index
    %c0_0 = arith.constant 0 : index
    %0 = vector.load %arg2[%c0, %c0_0] : memref<256x72xbf16, #tpu.memory_space<vmem>>, vector<256x72xbf16>
    %c0_1 = arith.constant 0 : index
    %c0_2 = arith.constant 0 : index
    %1 = vector.load %arg3[%c0_1, %c0_2] : memref<72x128xbf16, #tpu.memory_space<vmem>>, vector<72x128xbf16>
    %cst = arith.constant dense<0.000000e+00> : vector<256x128xf32>
    %2 = tpu.matmul %0, %1, %cst {dimension_numbers = #tpu.dot_dimension_numbers<[1], [0], [0], [1], [0, 0, 1, 1], [], []>} : vector<256x72xbf16>, vector<72x128xbf16>, vector<256x128xf32> -> vector<256x128xf32>
    %3 = arith.truncf %2 : vector<256x128xf32> to vector<256x128xbf16>
    %c0_3 = arith.constant 0 : index
    %c0_4 = arith.constant 0 : index
    %4 = vector.load %arg4[%c0_3, %c0_4] : memref<256x128xbf16, #tpu.memory_space<vmem>>, vector<256x128xbf16>
    tpu.vector_store %arg4[%c0_3, %c0_4], %3 {strides = array<i32>} : memref<256x128xbf16, #tpu.memory_space<vmem>>, vector<256x128xbf16>,
    %5 = tpu.iota {dimensions = array<i32: 0>} : vector<256x128xi32>
    %c256_i32 = arith.constant 256 : i32
    %6 = arith.muli %arg0, %c256_i32 : i32
    %7 = vector.broadcast %6 : i32 to vector<256x128xi32>
    %8 = arith.addi %5, %7 : vector<256x128xi32>
    %c512_i32 = arith.constant 512 : i32
    %9 = vector.broadcast %c512_i32 : i32 to vector<256x128xi32>
    %10 = arith.cmpi slt, %8, %9 : vector<256x128xi32>
    %cst_5 = arith.constant 0.000000e+00 : f32
    %11 = vector.broadcast %cst_5 : f32 to vector<256x128xf32>
    %12 = arith.select %10, %2, %11 : vector<256x128xi1>, vector<256x128xf32>
    %cst_6 = arith.constant dense<0.000000e+00> : vector<128xf32>
    %13 = vector.multi_reduction <add>, %12, %cst_6 [0] : vector<256x128xf32> to vector<128xf32>
    %14 = vector.shape_cast %13 : vector<128xf32> to vector<1x128xf32>
    %15 = arith.mulf %12, %12 : vector<256x128xf32>
    %cst_7 = arith.constant dense<0.000000e+00> : vector<128xf32>
    %16 = vector.multi_reduction <add>, %15, %cst_7 [0] : vector<256x128xf32> to vector<128xf32>
    %17 = vector.shape_cast %16 : vector<128xf32> to vector<1x128xf32>
    %18 = vector.shape_cast %14 : vector<1x128xf32> to vector<1x1x128xf32>
    %c0_8 = arith.constant 0 : index
    %c0_9 = arith.constant 0 : index
    %c0_10 = arith.constant 0 : index
    %19 = vector.load %arg5[%c0_8, %c0_9, %c0_10] : memref<1x1x128xf32, #tpu.memory_space<vmem>>, vector<1x1x128xf32>
    tpu.vector_store %arg5[%c0_8, %c0_9, %c0_10], %18 {strides = array<i32>} : memref<1x1x128xf32, #tpu.memory_space<vmem>>, vector<1x1x128xf32>,
    %20 = vector.shape_cast %17 : vector<1x128xf32> to vector<1x1x128xf32>
    %c0_11 = arith.constant 0 : index
    %c0_12 = arith.constant 0 : index
    %c0_13 = arith.constant 0 : index
    %21 = vector.load %arg6[%c0_11, %c0_12, %c0_13] : memref<1x1x128xf32, #tpu.memory_space<vmem>>, vector<1x1x128xf32>
    tpu.vector_store %arg6[%c0_11, %c0_12, %c0_13], %20 {strides = array<i32>} : memref<1x1x128xf32, #tpu.memory_space<vmem>>, vector<1x1x128xf32>,
    return
  }
  func.func @transform_0(%arg0: i32, %arg1: i32) -> (i32, i32) {
    %c0_i32 = arith.constant 0 : i32
    %c0_i32_0 = arith.constant 0 : i32
    return %arg0, %c0_i32 : i32, i32
  }
  func.func @transform_1(%arg0: i32, %arg1: i32) -> (i32, i32) {
    %c0_i32 = arith.constant 0 : i32
    %c0_i32_0 = arith.constant 0 : i32
    return %c0_i32, %arg1 : i32, i32
  }
  func.func @transform_2(%arg0: i32, %arg1: i32) -> (i32, i32) {
    %c0_i32 = arith.constant 0 : i32
    return %arg0, %arg1 : i32, i32
  }
  func.func @transform_3(%arg0: i32, %arg1: i32) -> (i32, i32, i32) {
    %c0_i32 = arith.constant 0 : i32
    %c0_i32_0 = arith.constant 0 : i32
    return %arg0, %c0_i32, %arg1 : i32, i32, i32
  }
  func.func @transform_4(%arg0: i32, %arg1: i32) -> (i32, i32, i32) {
    %c0_i32 = arith.constant 0 : i32
    %c0_i32_0 = arith.constant 0 : i32
    return %arg0, %c0_i32, %arg1 : i32, i32, i32
  }
}

module attributes {stable_mosaic.version = 11 : i64} {
  func.func @_bn_relu_apply_kernel(%arg0: i32, %arg1: memref<256x128xbf16, #tpu.memory_space<vmem>>, %arg2: memref<1x128xf32, #tpu.memory_space<vmem>>, %arg3: memref<1x128xf32, #tpu.memory_space<vmem>>, %arg4: memref<256x128xbf16, #tpu.memory_space<vmem>>) attributes {dimension_semantics = [#tpu.dimension_semantics<parallel>], iteration_bounds = array<i64: 2>, scalar_prefetch = 0 : i64, scratch_operands = 0 : i64, tpu.core_type = #tpu.core_type<tc>, window_params = [{transform_indices = @transform_0, window_bounds = array<i64: 256, 128>}, {pipeline_mode = #tpu.pipeline_mode<synchronous>, transform_indices = @transform_1, window_bounds = array<i64: 1, 128>}, {pipeline_mode = #tpu.pipeline_mode<synchronous>, transform_indices = @transform_2, window_bounds = array<i64: 1, 128>}, {transform_indices = @transform_3, window_bounds = array<i64: 256, 128>}]} {
    %c0 = arith.constant 0 : index
    %c0_0 = arith.constant 0 : index
    %0 = vector.load %arg1[%c0, %c0_0] : memref<256x128xbf16, #tpu.memory_space<vmem>>, vector<256x128xbf16>
    %1 = arith.extf %0 : vector<256x128xbf16> to vector<256x128xf32>
    %c0_1 = arith.constant 0 : index
    %c0_2 = arith.constant 0 : index
    %2 = vector.load %arg2[%c0_1, %c0_2] : memref<1x128xf32, #tpu.memory_space<vmem>>, vector<1x128xf32>
    %3 = vector.broadcast %2 : vector<1x128xf32> to vector<256x128xf32>
    %4 = arith.mulf %1, %3 : vector<256x128xf32>
    %c0_3 = arith.constant 0 : index
    %c0_4 = arith.constant 0 : index
    %5 = vector.load %arg3[%c0_3, %c0_4] : memref<1x128xf32, #tpu.memory_space<vmem>>, vector<1x128xf32>
    %6 = vector.broadcast %5 : vector<1x128xf32> to vector<256x128xf32>
    %7 = arith.addf %4, %6 : vector<256x128xf32>
    %cst = arith.constant 0.000000e+00 : f32
    %8 = vector.broadcast %cst : f32 to vector<256x128xf32>
    %9 = arith.maximumf %7, %8 : vector<256x128xf32>
    %10 = arith.truncf %9 : vector<256x128xf32> to vector<256x128xbf16>
    %c0_5 = arith.constant 0 : index
    %c0_6 = arith.constant 0 : index
    %11 = vector.load %arg4[%c0_5, %c0_6] : memref<256x128xbf16, #tpu.memory_space<vmem>>, vector<256x128xbf16>
    tpu.vector_store %arg4[%c0_5, %c0_6], %10 {strides = array<i32>} : memref<256x128xbf16, #tpu.memory_space<vmem>>, vector<256x128xbf16>,
    return
  }
  func.func @transform_0(%arg0: i32) -> (i32, i32) {
    %c0_i32 = arith.constant 0 : i32
    %c0_i32_0 = arith.constant 0 : i32
    return %arg0, %c0_i32 : i32, i32
  }
  func.func @transform_1(%arg0: i32) -> (i32, i32) {
    %c0_i32 = arith.constant 0 : i32
    %c0_i32_0 = arith.constant 0 : i32
    %c0_i32_1 = arith.constant 0 : i32
    return %c0_i32, %c0_i32_0 : i32, i32
  }
  func.func @transform_2(%arg0: i32) -> (i32, i32) {
    %c0_i32 = arith.constant 0 : i32
    %c0_i32_0 = arith.constant 0 : i32
    %c0_i32_1 = arith.constant 0 : i32
    return %c0_i32, %c0_i32_0 : i32, i32
  }
  func.func @transform_3(%arg0: i32) -> (i32, i32) {
    %c0_i32 = arith.constant 0 : i32
    %c0_i32_0 = arith.constant 0 : i32
    return %arg0, %c0_i32 : i32, i32
  }
}

</mosaic_0001>

<bundles_post_ra>
// kernel: _forward_impl.3
= control target key start
LH: loop header
LB: loop body
LE: loop exit
PB: predicated region body
PF: predicated region fallthrough
CT: control target
= control target key end

     0   :  { %s1571_s15 = smov 0   ;;  %s1573_s16 = smov 0   ;;  %s1853_s0 = inlined_call_operand.vmem [shape: bf16[512,72], index: 0, kind: input, shape index: {}]   ;;  %s1854_s1 = inlined_call_operand.vmem [shape: bf16[72,128], index: 1, kind: input, shape index: {}]   ;;  %s1855_s2 = inlined_call_operand.vmem [shape: bf16[512,128], index: 2, kind: output, shape index: {0}]   ;;  %s1856_s3 = inlined_call_operand.vmem [shape: f32[2,1,128], index: 3, kind: output, shape index: {1}]   ;;  %s1857_s4 = inlined_call_operand.vmem [shape: f32[2,1,128], index: 4, kind: output, shape index: {2}]  }
   0x1   :  { %s1575_s17 = smov 0  }
   0x2 LB: > { %s27_s18 = sadd.s32 1, %s1540_s16  ;;  %p1198_p0 = scmp.ge.s32.totalorder %s1544_s17, 1  ;;  %s1544_s17 = sphi %s1575_s17, %s15_s17   ;;  %s1540_s16 = sphi %s1573_s16, %s1859_s16   ;;  %s1536_s15 = sphi %s1571_s15, %s1858_s15  }
   0x3   : > { %p29_p1 = scmp.ge.s32.totalorder %s27_s18, 2  ;;  %p195_p2 = scmp.lt.s32.totalorder %s1544_s17, 3 }
   0x5   : > { %s1861_s18 = smov (%p29_p1, %s27_s18), 0  ;;  %p196_p3 = pnand %p1198_p0, %p195_p2 }
   0x6   : > { %v1501_v0 = vld [vmem:[%s1854_s1] sm:$0xff] (!%p196_p3)   ;;  %v1502_v1 = vld [vmem:[%s1854_s1 + $0x8] sm:$0xff] (!%p196_p3)   ;;  %s1199_s23 = sshll.u32 (!%p196_p3), %s1536_s15, 5  ;;  %v1503_v2 = vld [vmem:[%s1854_s1 + $0x10] sm:$0xff] (!%p196_p3)   ;;  %vm420_vm0 = vcmask (!%p196_p3), 588800   ;;  %vm469_vm1 = vcmask (!%p196_p3), 1043456   ;;  %v794_v22 = vlaneseq (!%p196_p3) }
   0x7   : > { %199 = sbr.rel (%p196_p3) target bundleno = 320 (0x140), region = 28  ;;  %1423 = vmatprep.subr.bf16.mxu0 (!%p196_p3), %v1501_v0  ;;  %p241_p4 = scmp.lt.s32.totalorder (!%p196_p3), %s1199_s23, 63  ;;  %1465 = vmatprep.subr.bf16.mxu1 (!%p196_p3), %v1501_v0  ;;  %v1504_v3 = vld [vmem:[%s1854_s1 + $0x18] sm:$0xff] (!%p196_p3)   ;;  %v1505_v5 = vld [vmem:[%s1854_s1 + $0x20] ss:$0 sps:$4 sm:$0xff] (!%p196_p3)  }
   0x8   : > { %1424 = vmatpush3.bf16.msra.mxu0 (!%p196_p3), %v1501_v0  ;;  %1470 = vmatpush3.bf16.msra.mxu1 (!%p196_p3), %v1501_v0  ;;  %v471_v6 = vsel (!%p196_p3), %vm469_vm1, %v1505_v5, 0  ;;  %v1649_v23 = vshrl.u32 (!%p196_p3), %v794_v22, 7  ;;  %s1272_s8 = sshll.u32 (!%p196_p3), %s1536_s15, 8  ;;  %p259_p5 = scmp.lt.s32.totalorder (!%p196_p3), %s1536_s15, 1 }
   0x9   : > { %1425 = vmatprep.subr.bf16.mxu0 (!%p196_p3), %v1502_v1  ;;  %1466 = vmatprep.subr.bf16.mxu1 (!%p196_p3), %v1502_v1  ;;  %v1652_v24 = vstv (!%p196_p3), %s1272_s8 }
   0xa   : > { %v797_v25 = vadd.s32 (!%p196_p3), 16, %v1649_v23  ;;  %v798_v26 = vadd.s32 (!%p196_p3), 24, %v1649_v23  ;;  %v796_v27 = vadd.s32 (!%p196_p3), 8, %v1649_v23  ;;  %v829_v28 = vadd.s32 (!%p196_p3), %v1652_v24, %v1649_v23 }
   0xb   : > { %v801_v32 = vadd.s32 (!%p196_p3), 48, %v1649_v23  ;;  %v799_v33 = vadd.s32 (!%p196_p3), 32, %v1649_v23  ;;  %v802_v34 = vadd.s32 (!%p196_p3), 56, %v1649_v23  ;;  %v800_v35 = vadd.s32 (!%p196_p3), 40, %v1649_v23 }
   0xc   : > { %1426 = vmatpush3.bf16.msra.mxu0 (!%p196_p3), %v1502_v1  ;;  %1471 = vmatpush3.bf16.msra.mxu1 (!%p196_p3), %v1502_v1  ;;  %v831_v29 = vadd.s32 (!%p196_p3), %v1652_v24, %v797_v25  ;;  %v832_v30 = vadd.s32 (!%p196_p3), %v1652_v24, %v798_v26  ;;  %v830_v31 = vadd.s32 (!%p196_p3), %v1652_v24, %v796_v27  ;;  %vm861_vm2 = vcmp.lt.s32.totalorder (!%p196_p3), %v829_v28, 512 }
   0xd   : > { %1427 = vmatprep.subr.bf16.mxu0 (!%p196_p3), %v1503_v2  ;;  %1467 = vmatprep.subr.bf16.mxu1 (!%p196_p3), %v1503_v2  ;;  %v805_v36 = vadd.s32 (!%p196_p3), 80, %v1649_v23  ;;  %v835_v43 = vadd.s32 (!%p196_p3), %v1652_v24, %v801_v32  ;;  %v833_v44 = vadd.s32 (!%p196_p3), %v1652_v24, %v799_v33  ;;  %v836_v45 = vadd.s32 (!%p196_p3), %v1652_v24, %v802_v34 }
   0xe   : > { %s1863_s23 = smov (!%p241_p4, %s1199_s23), 63  ;;  %vm863_vm3 = vcmp.lt.s32.totalorder %v831_v29, 512  ;;  %vm864_vm4 = vcmp.lt.s32.totalorder %v832_v30, 512  ;;  %vm862_vm5 = vcmp.lt.s32.totalorder %v830_v31, 512  ;;  %v834_v49 = vadd.s32 %v1652_v24, %v800_v35  ;;  %s1865_s15 = smov (!%p259_p5, %s1536_s15), 1 }
   0xf   : > { %s1200_s26 = sshll.u32 %s1863_s23, 2  ;;  %v1685_v50 = vadd.s32 %v1652_v24, %v805_v36  ;;  %v803_v51 = vadd.s32 64, %v1649_v23  ;;  %v806_v62 = vadd.s32 88, %v1649_v23  ;;  %v804_v63 = vadd.s32 72, %v1649_v23  ;;  %s264_s14 = scalar_lea.vmem %s1856_s3, %s1865_s15 }
  0x10   : > { %s1612_s5 = scalar_lea.vmem %s1853_s0, %s1200_s26  ;;  %1428 = vmatpush3.bf16.msra.mxu0 %v1503_v2  ;;  %1472 = vmatpush3.bf16.msra.mxu1 %v1503_v2  ;;  %s1676_s11 = scalar_lea.vmem %s1855_s2, %s1200_s26  ;;  %vm865_vm6 = vcmp.lt.s32.totalorder %v833_v44, 512  ;;  %vm867_vm7 = vcmp.lt.s32.totalorder %v835_v43, 512  ;;  %vm868_vm8 = vcmp.lt.s32.totalorder %v836_v45, 512  ;;  %vm866_vm9 = vcmp.lt.s32.totalorder %v834_v49, 512 }
  0x11   : > { %v1506_v4 = vld [vmem:[%s1612_s5] sm:$0xff]   ;;  %1429 = vmatprep.subr.bf16.mxu0 %v1504_v3  ;;  %1468 = vmatprep.subr.bf16.mxu1 %v1504_v3  ;;  %v1507_v7 = vld [vmem:[%s1612_s5 + $0x8] sm:$0xff]   ;;  %v1508_v9 = vld [vmem:[%s1612_s5 + $0x10] sm:$0xff]   ;;  %vm871_vm10 = vcmp.lt.s32.totalorder %v1685_v50, 512  ;;  %v807_v28 = vadd.s32 96, %v1649_v23  ;;  %v810_v32 = vadd.s32 120, %v1649_v23  ;;  %s270_s21 = scalar_lea.vmem %s1857_s4, %s1865_s15 }
  0x12   : > { %1433 = vmatprep.mubr.msk.bf16.mxu0 %vm420_vm0, %v1506_v4  ;;  %v1514_v8 = vld [vmem:[%s1612_s5 + $0x40] sm:$0xff]   ;;  %v1515_v10 = vld [vmem:[%s1612_s5 + $0x48] sm:$0xff]   ;;  %v1516_v11 = vld [vmem:[%s1612_s5 + $0x50] sm:$0xff]   ;;  %v837_v4 = vadd.s32 %v1652_v24, %v803_v51  ;;  %v808_v34 = vadd.s32 104, %v1649_v23 }
  0x13   : > { %1449 = vmatprep.mubr.msk.bf16.mxu1 %vm420_vm0, %v1514_v8  ;;  %v1509_v12 = vld [vmem:[%s1612_s5 + $0x18] sm:$0xff]   ;;  %v1510_v14 = vld [vmem:[%s1612_s5 + $0x20] sm:$0xff]   ;;  %v1511_v16 = vld [vmem:[%s1612_s5 + $0x28] sm:$0xff]   ;;  %v841_v44 = vadd.s32 %v1652_v24, %v807_v28 }
  0x14   : > { %1430 = vmatpush3.bf16.msra.mxu0 %v1504_v3  ;;  %1473 = vmatpush3.bf16.msra.mxu1 %v1504_v3  ;;  %v1517_v13 = vld [vmem:[%s1612_s5 + $0x58] sm:$0xff]   ;;  %v1518_v15 = vld [vmem:[%s1612_s5 + $0x60] sm:$0xff]   ;;  %v1519_v17 = vld [vmem:[%s1612_s5 + $0x68] sm:$0xff]   ;;  %vm869_vm11 = vcmp.lt.s32.totalorder %v837_v4, 512 }
  0x15   : > { %1475 = vmatprep.subr.msk.bf16.mxu0 %vm469_vm1, %v1505_v5  ;;  %1476 = vmatprep.subr.msk.bf16.mxu1 %vm469_vm1, %v1505_v5  ;;  %v1512_v18 = vld [vmem:[%s1612_s5 + $0x30] sm:$0xff]   ;;  %v1513_v20 = vld [vmem:[%s1612_s5 + $0x38] sm:$0xff]   ;;  %vm873_vm14 = vcmp.lt.s32.totalorder %v841_v44, 512 }
  0x16   : > { %v1520_v19 = vld [vmem:[%s1612_s5 + $0x70] sm:$0xff]   ;;  %v1521_v21 = vld [vmem:[%s1612_s5 + $0x78] sm:$0xff]  }
  0x18   : > { %1432 = vmatpush3.bf16.msra.mxu0 %v471_v6  ;;  %1474 = vmatpush3.bf16.msra.mxu1 %v471_v6 }
  0x1b   : > { %1434 = vmatmul.mubr.msk.bf16.vlgmr.msra.gmra.mrb[0].mxu0 %vm420_vm0, %v1507_v7  ;;  %1450 = vmatmul.mubr.msk.bf16.vlgmr.msra.gmra.mrb[0].mxu1 %vm420_vm0, %v1515_v10 }
  0x1c   : > { %1437 = vmatprep.mubr.msk.bf16.mxu0 %vm420_vm0, %v1508_v9  ;;  %1453 = vmatprep.mubr.msk.bf16.mxu1 %vm420_vm0, %v1516_v11 }
  0x23   : > { %1438 = vmatmul.mubr.msk.bf16.gmra.mrb[4].mxu0 %vm420_vm0, %v1509_v12  ;;  %1454 = vmatmul.mubr.msk.bf16.gmra.mrb[4].mxu1 %vm420_vm0, %v1517_v13  ;;  %v1710_v13 = vadd.s32 %v1652_v24, %v806_v62 }
  0x24   : > { %1441 = vmatprep.mubr.msk.bf16.mxu0 %vm420_vm0, %v1510_v14  ;;  %1457 = vmatprep.mubr.msk.bf16.mxu1 %vm420_vm0, %v1518_v15  ;;  %v838_v14 = vadd.s32 %v1652_v24, %v804_v63  ;;  %v809_v15 = vadd.s32 112, %v1649_v23 }
  0x25   : > { %vm872_vm12 = vcmp.lt.s32.totalorder %v1710_v13, 512 }
  0x26   : > { %vm870_vm13 = vcmp.lt.s32.totalorder %v838_v14, 512  ;;  %v1732_v43 = vadd.s32 %v1652_v24, %v809_v15 }
  0x28   : > { %vm875_vm15 = vcmp.lt.s32.totalorder %v1732_v43, 512 }
  0x2b   : > { %1442 = vmatmul.mubr.msk.bf16.gmra.mrb[8].mxu0 %vm420_vm0, %v1511_v16  ;;  %1458 = vmatmul.mubr.msk.bf16.gmra.mrb[8].mxu1 %vm420_vm0, %v1519_v17 }
  0x2c   : > { %1445 = vmatprep.mubr.msk.bf16.mxu0 %vm420_vm0, %v1512_v18  ;;  %1461 = vmatprep.mubr.msk.bf16.mxu1 %vm420_vm0, %v1520_v19 }
  0x33   : > { %1446 = vmatmul.mubr.msk.bf16.gmra.mrb[12].mxu0 %vm420_vm0, %v1513_v20  ;;  %1462 = vmatmul.mubr.msk.bf16.gmra.mrb[12].mxu1 %vm420_vm0, %v1521_v21 }
  0xee   : > { %v1435_v37 = vpop.f32.mrb[0].mxu0  ;;  %v1667_v38 = vpop.f32.mrb[0].mxu1 }
  0xef   : > { %v507_v39 = vpop.f32.mrb[1].mxu0  ;;  %v1669_v40 = vpop.f32.mrb[1].mxu1  ;;  %v895_v53 = vsel %vm863_vm3, %v1435_v37, 0.0 }
  0xf0   : > { %v893_v41 = vsel %vm861_vm2, %v507_v39, 0.0  ;;  %v1436_v42 = vpop.f32.mrb[2].mxu0  ;;  %v1681_v46 = vpop.f32.mrb[2].mxu1  ;;  %v964_v0 = vmul.f32 %v895_v53, %v895_v53 }
  0xf1   : > { %v1315_v47 = vpack.c.bf16 %v1436_v42, %v1435_v37  ;;  %v510_v48 = vpop.f32.mrb[3].mxu0  ;;  %v1688_v52 = vpop.f32.mrb[3].mxu1  ;;  %v1355_v56 = vpack.c.bf16 %v1681_v46, %v1667_v38  ;;  %v962_v57 = vmul.f32 %v893_v41, %v893_v41  ;;  %v896_v61 = vsel %vm864_vm4, %v1436_v42, 0.0 }
  0xf2   : > { %v1310_v54 = vpack.c.bf16 %v510_v48, %v507_v39  ;;  %v894_v55 = vsel %vm862_vm5, %v510_v48, 0.0  ;;  %v1350_v60 = vpack.c.bf16 %v1688_v52, %v1669_v40  ;;  %v965_v6 = vmul.f32 %v896_v61, %v896_v61 }
  0xf3   : > { %1387 = vst [vmem:[%s1676_s11 + $0x8] sm:$0xff] %v1315_v47   ;;  %v925_v58 = vadd.f32 %v894_v55, %v893_v41  ;;  %v963_v59 = vmul.f32 %v894_v55, %v894_v55  ;;  %1395 = vst [vmem:[%s1676_s11 + $0x48] sm:$0xff] %v1355_v56  }
  0xf4   : > { %1311 = vst [vmem:[%s1676_s11] sm:$0xff] %v1310_v54   ;;  %1394 = vst [vmem:[%s1676_s11 + $0x40] sm:$0xff] %v1350_v60  }
  0xf5   : > { %v926_v1 = vadd.f32 %v925_v58, %v895_v53  ;;  %v994_v2 = vadd.f32 %v963_v59, %v962_v57  ;;  %v1740_v53 = vadd.s32 %v1652_v24, %v810_v32  ;;  %v842_v57 = vadd.s32 %v1652_v24, %v808_v34 }
  0xf6   : > { %v1439_v3 = vpop.f32.mrb[4].mxu0  ;;  %v1704_v5 = vpop.f32.mrb[4].mxu1  ;;  %v813_v58 = vadd.s32 144, %v1649_v23  ;;  %v811_v59 = vadd.s32 128, %v1649_v23 }
  0xf7   : > { %v995_v7 = vadd.f32 %v994_v2, %v964_v0  ;;  %v523_v8 = vpop.f32.mrb[5].mxu0  ;;  %v927_v9 = vadd.f32 %v926_v1, %v896_v61  ;;  %v1707_v10 = vpop.f32.mrb[5].mxu1  ;;  %v899_v25 = vsel %vm867_vm7, %v1439_v3, 0.0  ;;  %vm876_vm0 = vcmp.lt.s32.totalorder %v1740_v53, 512 }
  0xf8   : > { %v897_v11 = vsel %vm865_vm6, %v523_v8, 0.0  ;;  %v1440_v12 = vpop.f32.mrb[6].mxu0  ;;  %v1714_v16 = vpop.f32.mrb[6].mxu1  ;;  %v968_v37 = vmul.f32 %v899_v25, %v899_v25  ;;  %v845_v50 = vadd.s32 %v1652_v24, %v811_v59  ;;  %vm874_vm1 = vcmp.lt.s32.totalorder %v842_v57, 512 }
  0xf9   : > { %v928_v17 = vadd.f32 %v927_v9, %v897_v11  ;;  %v966_v18 = vmul.f32 %v897_v11, %v897_v11  ;;  %v996_v19 = vadd.f32 %v995_v7, %v965_v6  ;;  %v1325_v20 = vpack.c.bf16 %v1440_v12, %v1439_v3  ;;  %v526_v21 = vpop.f32.mrb[7].mxu0  ;;  %v1716_v22 = vpop.f32.mrb[7].mxu1 }
  0xfa   : > { %v1320_v26 = vpack.c.bf16 %v526_v21, %v523_v8  ;;  %v898_v27 = vsel %vm866_vm9, %v526_v21, 0.0  ;;  %v900_v33 = vsel %vm868_vm8, %v1440_v12, 0.0  ;;  %v1365_v35 = vpack.c.bf16 %v1714_v16, %v1704_v5 }
  0xfb   : > { %v997_v29 = vadd.f32 %v996_v19, %v966_v18  ;;  %1389 = vst [vmem:[%s1676_s11 + $0x18] sm:$0xff] %v1325_v20   ;;  %v929_v30 = vadd.f32 %v928_v17, %v898_v27  ;;  %v967_v31 = vmul.f32 %v898_v27, %v898_v27  ;;  %v1360_v36 = vpack.c.bf16 %v1716_v22, %v1707_v10 }
  0xfc   : > { %1388 = vst [vmem:[%s1676_s11 + $0x10] sm:$0xff] %v1320_v26   ;;  %1397 = vst [vmem:[%s1676_s11 + $0x58] sm:$0xff] %v1365_v35   ;;  %v969_v47 = vmul.f32 %v900_v33, %v900_v33  ;;  %v812_v7 = vadd.s32 136, %v1649_v23  ;;  %v814_v12 = vadd.s32 152, %v1649_v23  ;;  %vm877_vm2 = vcmp.lt.s32.totalorder %v845_v50, 512 }
  0xfd   : > { %v930_v39 = vadd.f32 %v929_v30, %v899_v25  ;;  %v998_v41 = vadd.f32 %v997_v29, %v967_v31  ;;  %1396 = vst [vmem:[%s1676_s11 + $0x50] sm:$0xff] %v1360_v36   ;;  %v847_v30 = vadd.s32 %v1652_v24, %v813_v58  ;;  %v815_v35 = vadd.s32 160, %v1649_v23 }
  0xfe   : > { %v1443_v42 = vpop.f32.mrb[8].mxu0  ;;  %v1737_v45 = vpop.f32.mrb[8].mxu1  ;;  %v846_v13 = vadd.s32 %v1652_v24, %v812_v7  ;;  %v848_v34 = vadd.s32 %v1652_v24, %v814_v12  ;;  %v816_v59 = vadd.s32 168, %v1649_v23  ;;  %v909_v43 = vsel %vm877_vm2, %v1669_v40, 0.0 }
  0xff   : > { %v999_v48 = vadd.f32 %v998_v41, %v968_v37  ;;  %v539_v49 = vpop.f32.mrb[9].mxu0  ;;  %v931_v51 = vadd.f32 %v930_v39, %v900_v33  ;;  %v1742_v54 = vpop.f32.mrb[9].mxu1  ;;  %v903_v3 = vsel %vm871_vm10, %v1443_v42, 0.0  ;;  %vm879_vm4 = vcmp.lt.s32.totalorder %v847_v30, 512 }
 0x100   : > { %v901_v55 = vsel %vm869_vm11, %v539_v49, 0.0  ;;  %v1444_v56 = vpop.f32.mrb[10].mxu0  ;;  %v1747_v60 = vpop.f32.mrb[10].mxu1  ;;  %v972_v18 = vmul.f32 %v903_v3, %v903_v3  ;;  %vm878_vm3 = vcmp.lt.s32.totalorder %v846_v13, 512  ;;  %v818_v53 = vadd.s32 184, %v1649_v23 }
 0x101   : > { %v932_v61 = vadd.f32 %v931_v51, %v901_v55  ;;  %v970_v62 = vmul.f32 %v901_v55, %v901_v55  ;;  %v1000_v63 = vadd.f32 %v999_v48, %v969_v47  ;;  %v1335_v0 = vpack.c.bf16 %v1444_v56, %v1443_v42  ;;  %v542_v1 = vpop.f32.mrb[11].mxu0  ;;  %v1749_v2 = vpop.f32.mrb[11].mxu1 }
 0x102   : > { %v1330_v4 = vpack.c.bf16 %v542_v1, %v539_v49  ;;  %v902_v6 = vsel %vm870_vm13, %v542_v1, 0.0  ;;  %v904_v15 = vsel %vm872_vm12, %v1444_v56, 0.0  ;;  %v1375_v14 = vpack.c.bf16 %v1747_v60, %v1737_v45 }
 0x103   : > { %v1001_v8 = vadd.f32 %v1000_v63, %v970_v62  ;;  %1391 = vst [vmem:[%s1676_s11 + $0x28] sm:$0xff] %v1335_v0   ;;  %v933_v9 = vadd.f32 %v932_v61, %v902_v6  ;;  %v971_v11 = vmul.f32 %v902_v6, %v902_v6  ;;  %v1370_v17 = vpack.c.bf16 %v1749_v2, %v1742_v54 }
 0x104   : > { %1390 = vst [vmem:[%s1676_s11 + $0x20] sm:$0xff] %v1330_v4   ;;  %1399 = vst [vmem:[%s1676_s11 + $0x68] sm:$0xff] %v1375_v14   ;;  %v973_v26 = vmul.f32 %v904_v15, %v904_v15  ;;  %v817_v4 = vadd.s32 176, %v1649_v23  ;;  %vm880_vm5 = vcmp.lt.s32.totalorder %v848_v34, 512  ;;  %v819_v50 = vadd.s32 192, %v1649_v23 }
 0x105   : > { %v934_v19 = vadd.f32 %v933_v9, %v903_v3  ;;  %v1002_v20 = vadd.f32 %v1001_v8, %v971_v11  ;;  %1398 = vst [vmem:[%s1676_s11 + $0x60] sm:$0xff] %v1370_v17   ;;  %v849_v3 = vadd.s32 %v1652_v24, %v815_v35  ;;  %v978_v8 = vmul.f32 %v909_v43, %v909_v43 }
 0x106   : > { %v1447_v21 = vpop.f32.mrb[12].mxu0  ;;  %v1770_v25 = vpop.f32.mrb[12].mxu1  ;;  %v910_v9 = vsel %vm878_vm3, %v1688_v52, 0.0  ;;  %v850_v11 = vadd.s32 %v1652_v24, %v816_v59  ;;  %v911_v14 = vsel %vm879_vm4, %v1667_v38, 0.0  ;;  %v851_v17 = vadd.s32 %v1652_v24, %v817_v4 }
 0x107   : > { %v1003_v27 = vadd.f32 %v1002_v20, %v972_v18  ;;  %v555_v28 = vpop.f32.mrb[13].mxu0  ;;  %v935_v29 = vadd.f32 %v934_v19, %v904_v15  ;;  %v1773_v31 = vpop.f32.mrb[13].mxu1  ;;  %v907_v48 = vsel %vm875_vm15, %v1447_v21, 0.0  ;;  %vm881_vm6 = vcmp.lt.s32.totalorder %v849_v3, 512 }
 0x108   : > { %v905_v32 = vsel %vm873_vm14, %v555_v28, 0.0  ;;  %v1448_v33 = vpop.f32.mrb[14].mxu0  ;;  %v1777_v36 = vpop.f32.mrb[14].mxu1  ;;  %v976_v63 = vmul.f32 %v907_v48, %v907_v48  ;;  %v979_v20 = vmul.f32 %v910_v9, %v910_v9  ;;  %v912_v13 = vsel %vm880_vm5, %v1681_v46, 0.0 }
 0x109   : > { %v936_v37 = vadd.f32 %v935_v29, %v905_v32  ;;  %v974_v39 = vmul.f32 %v905_v32, %v905_v32  ;;  %v1004_v41 = vadd.f32 %v1003_v27, %v973_v26  ;;  %v1345_v42 = vpack.c.bf16 %v1448_v33, %v1447_v21  ;;  %v558_v44 = vpop.f32.mrb[15].mxu0  ;;  %v1779_v47 = vpop.f32.mrb[15].mxu1 }
 0x10a   : > { %v1340_v49 = vpack.c.bf16 %v558_v44, %v555_v28  ;;  %v906_v51 = vsel %vm874_vm1, %v558_v44, 0.0  ;;  %v908_v61 = vsel %vm876_vm0, %v1448_v33, 0.0  ;;  %v1385_v57 = vpack.c.bf16 %v1777_v36, %v1770_v25 }
 0x10b   : > { %v1005_v55 = vadd.f32 %v1004_v41, %v974_v39  ;;  %1393 = vst [vmem:[%s1676_s11 + $0x38] sm:$0xff] %v1345_v42   ;;  %v937_v56 = vadd.f32 %v936_v37, %v906_v51  ;;  %v975_v58 = vmul.f32 %v906_v51, %v906_v51  ;;  %v1380_v62 = vpack.c.bf16 %v1779_v47, %v1773_v31 }
 0x10c   : > { %1392 = vst [vmem:[%s1676_s11 + $0x30] sm:$0xff] %v1340_v49   ;;  %1401 = vst [vmem:[%s1676_s11 + $0x78] sm:$0xff] %v1385_v57   ;;  %v977_v6 = vmul.f32 %v908_v61, %v908_v61  ;;  %v852_v21 = vadd.s32 %v1652_v24, %v818_v53  ;;  %v913_v52 = vsel %vm881_vm6, %v1707_v10, 0.0  ;;  %vm882_vm7 = vcmp.lt.s32.totalorder %v850_v11, 512 }
 0x10d   : > { %v938_v0 = vadd.f32 %v937_v56, %v907_v48  ;;  %v1006_v1 = vadd.f32 %v1005_v55, %v975_v58  ;;  %1400 = vst [vmem:[%s1676_s11 + $0x70] sm:$0xff] %v1380_v62   ;;  %v820_v26 = vadd.s32 200, %v1649_v23  ;;  %v980_v27 = vmul.f32 %v911_v14, %v911_v14 }
 0x10e   : > { %v853_v30 = vadd.s32 %v1652_v24, %v819_v50  ;;  %vm883_vm8 = vcmp.lt.s32.totalorder %v851_v17, 512  ;;  %v821_v38 = vadd.s32 208, %v1649_v23  ;;  %v822_v32 = vadd.s32 216, %v1649_v23 }
 0x10f   : > { %v1007_v40 = vadd.f32 %v1006_v1, %v976_v63  ;;  %v939_v7 = vadd.f32 %v938_v0, %v908_v61  ;;  %v981_v33 = vmul.f32 %v912_v13, %v912_v13  ;;  %v982_v37 = vmul.f32 %v913_v52, %v913_v52 }
 0x110   : > { %vm884_vm9 = vcmp.lt.s32.totalorder %v852_v21, 512  ;;  %v914_v46 = vsel %vm882_vm7, %v1716_v22, 0.0  ;;  %v854_v10 = vadd.s32 %v1652_v24, %v820_v26  ;;  %vm885_vm10 = vcmp.lt.s32.totalorder %v853_v30, 512 }
 0x111   : > { %v940_v12 = vadd.f32 %v939_v7, %v909_v43  ;;  %v1008_v15 = vadd.f32 %v1007_v40, %v977_v6  ;;  %v823_v42 = vadd.s32 224, %v1649_v23  ;;  %v915_v44 = vsel %vm883_vm8, %v1704_v5, 0.0 }
 0x112   : > { %v855_v48 = vadd.s32 %v1652_v24, %v821_v38  ;;  %v983_v55 = vmul.f32 %v914_v46, %v914_v46  ;;  %v856_v56 = vadd.s32 %v1652_v24, %v822_v32  ;;  %v916_v58 = vsel %vm884_vm9, %v1714_v16, 0.0 }
 0x113   : > { %v1009_v18 = vadd.f32 %v1008_v15, %v978_v8  ;;  %v941_v19 = vadd.f32 %v940_v12, %v910_v9  ;;  %v917_v22 = vsel %vm885_vm10, %v1742_v54, 0.0  ;;  %vm886_vm11 = vcmp.lt.s32.totalorder %v854_v10, 512 }
 0x114   : > { %v824_v59 = vadd.s32 232, %v1649_v23  ;;  %v984_v61 = vmul.f32 %v915_v44, %v915_v44  ;;  %v857_v62 = vadd.s32 %v1652_v24, %v823_v42  ;;  %vm887_vm12 = vcmp.lt.s32.totalorder %v855_v48, 512 }
 0x115   : > { %v942_v28 = vadd.f32 %v941_v19, %v911_v14  ;;  %v1010_v29 = vadd.f32 %v1009_v18, %v979_v20  ;;  %v825_v5 = vadd.s32 240, %v1649_v23  ;;  %v985_v63 = vmul.f32 %v916_v58, %v916_v58 }
 0x116   : > { %v986_v3 = vmul.f32 %v917_v22, %v917_v22  ;;  %vm888_vm13 = vcmp.lt.s32.totalorder %v856_v56, 512  ;;  %v918_v16 = vsel %vm886_vm11, %v1749_v2, 0.0  ;;  %v826_v54 = vadd.s32 248, %v1649_v23 }
 0x117   : > { %v1011_v34 = vadd.f32 %v1010_v29, %v980_v27  ;;  %v943_v35 = vadd.f32 %v942_v28, %v912_v13  ;;  %vm889_vm14 = vcmp.lt.s32.totalorder %v857_v62, 512  ;;  %v858_v6 = vadd.s32 %v1652_v24, %v824_v59 }
 0x118   : > { %v919_v40 = vsel %vm887_vm12, %v1737_v45, 0.0  ;;  %v859_v7 = vadd.s32 %v1652_v24, %v825_v5  ;;  %v987_v11 = vmul.f32 %v918_v16, %v918_v16  ;;  %v920_v12 = vsel %vm888_vm13, %v1747_v60, 0.0 }
 0x119   : > { %v944_v39 = vadd.f32 %v943_v35, %v913_v52  ;;  %v1012_v41 = vadd.f32 %v1011_v34, %v981_v33  ;;  %v921_v15 = vsel %vm889_vm14, %v1773_v31, 0.0  ;;  %v860_v2 = vadd.s32 %v1652_v24, %v826_v54 }
 0x11a   : > { %v988_v50 = vmul.f32 %v919_v40, %v919_v40  ;;  %vm890_vm15 = vcmp.lt.s32.totalorder %v858_v6, 512  ;;  %vm891_vm0 = vcmp.lt.s32.totalorder %v859_v7, 512  ;;  %v989_v17 = vmul.f32 %v920_v12, %v920_v12 }
 0x11b   : > { %v1013_v49 = vadd.f32 %v1012_v41, %v982_v37  ;;  %v945_v51 = vadd.f32 %v944_v39, %v914_v46  ;;  %v990_v45 = vmul.f32 %v921_v15, %v921_v15  ;;  %v922_v20 = vsel %vm890_vm15, %v1779_v47, 0.0 }
 0x11c   : > { %vm892_vm1 = vcmp.lt.s32.totalorder %v860_v2, 512  ;;  %v923_v60 = vsel %vm891_vm0, %v1770_v25, 0.0  ;;  %v991_v24 = vmul.f32 %v922_v20, %v922_v20 }
 0x11d   : > { %v946_v43 = vadd.f32 %v945_v51, %v915_v44  ;;  %v1014_v57 = vadd.f32 %v1013_v49, %v983_v55  ;;  %v924_v26 = vsel %vm892_vm1, %v1777_v36, 0.0  ;;  %v992_v27 = vmul.f32 %v923_v60, %v923_v60 }
 0x11e   : > { %v993_v30 = vmul.f32 %v924_v26, %v924_v26 }
 0x11f   : > { %v1015_v0 = vadd.f32 %v1014_v57, %v984_v61  ;;  %v947_v1 = vadd.f32 %v946_v43, %v916_v58 }
 0x121   : > { %v948_v4 = vadd.f32 %v947_v1, %v917_v22  ;;  %v1016_v53 = vadd.f32 %v1015_v0, %v985_v63 }
 0x123   : > { %v1017_v8 = vadd.f32 %v1016_v53, %v986_v3  ;;  %v949_v9 = vadd.f32 %v948_v4, %v918_v16 }
 0x125   : > { %v950_v23 = vadd.f32 %v949_v9, %v919_v40  ;;  %v1018_v14 = vadd.f32 %v1017_v8, %v987_v11 }
 0x127   : > { %v1019_v18 = vadd.f32 %v1018_v14, %v988_v50  ;;  %v951_v19 = vadd.f32 %v950_v23, %v920_v12 }
 0x129   : > { %v952_v21 = vadd.f32 %v951_v19, %v921_v15  ;;  %v1020_v13 = vadd.f32 %v1019_v18, %v989_v17 }
 0x12b   : > { %v1021_v31 = vadd.f32 %v1020_v13, %v990_v45  ;;  %v953_v52 = vadd.f32 %v952_v21, %v922_v20 }
 0x12d   : > { %v954_v28 = vadd.f32 %v953_v52, %v923_v60  ;;  %v1022_v29 = vadd.f32 %v1021_v31, %v991_v24 }
 0x12f   : > { %v955_v38 = vadd.f32 %v954_v28, %v924_v26  ;;  %v1023_v32 = vadd.f32 %v1022_v29, %v992_v27 }
 0x131   : > { %v956_v33 = vrot.slane %v955_v38, 4  ;;  %v1024_v47 = vadd.f32 %v1023_v32, %v993_v30 }
 0x133   : > { %v957_v34 = vadd.f32 %v956_v33, %v955_v38  ;;  %v1025_v35 = vrot.slane %v1024_v47, 4 }
 0x135   : > { %v958_v37 = vrot.slane %v957_v34, 2  ;;  %v1026_v46 = vadd.f32 %v1025_v35, %v1024_v47 }
 0x137   : > { %v959_v25 = vadd.f32 %v958_v37, %v957_v34  ;;  %v1027_v10 = vrot.slane %v1026_v46, 2 }
 0x139   : > { %v960_v39 = vrot.slane %v959_v25, 1  ;;  %v1028_v41 = vadd.f32 %v1027_v10, %v1026_v46 }
 0x13b   : > { %v961_v36 = vadd.f32 %v960_v39, %v959_v25  ;;  %v1029_v42 = vrot.slane %v1028_v41, 1 }
 0x13d   : > { %v1030_v44 = vadd.f32 %v1029_v42, %v1028_v41  ;;  %1031 = vst [vmem:[%s264_s14] sm:$0x1] %v961_v36 }
 0x13f   : > { %1032 = vst [vmem:[%s270_s21] sm:$0x1] %v1030_v44 }
 0x140 PF: > { %s15_s17 = sadd.s32 1, %s1544_s17   ;;  %s1858_s15 = smov %s1540_s16 }
 0x141   : > { %p12_p6 = scmp.ge.s32.totalorder %s15_s17, 4   ;;  %s1859_s16 = smov %s1861_s18 }
 0x143   :  { %14 = sbr.rel (!%p12_p6) target bundleno = 2 (0x2), region = 85 }

// kernel: _forward_impl.5
= control target key start
LH: loop header
LB: loop body
LE: loop exit
PB: predicated region body
PF: predicated region fallthrough
CT: control target
= control target key end

     0   :  { %s851_s12 = smov 0   ;;  %s985_s0 = inlined_call_operand.vmem [shape: bf16[512,128], index: 0, kind: input, shape index: {}]   ;;  %s986_s1 = inlined_call_operand.vmem [shape: f32[1,128], index: 1, kind: input, shape index: {}]   ;;  %s987_s2 = inlined_call_operand.vmem [shape: f32[1,128], index: 2, kind: input, shape index: {}]   ;;  %s988_s3 = inlined_call_operand.vmem [shape: bf16[512,128], index: 3, kind: output, shape index: {}]  }
   0x1 LB: > { %s564_s13 = sadd.s32 4294967295, %s829_s12   ;;  %p568_p0 = scmp.ge.s32.totalorder %s829_s12, 1  ;;  %s829_s12 = sphi %s851_s12, %s13_s12  }
   0x2   : > { %p138_p1 = scmp.lt.s32.totalorder %s829_s12, 3 }
   0x4   : > { %p139_p2 = pnand %p568_p0, %p138_p1 }
   0x5   : > { %s569_s14 = sshll.u32 (!%p139_p2), %s564_s13, 5  ;;  %v872_v0 = vld [vmem:[%s986_s1] ss:$0 sm:$0xff] (!%p139_p2) }
   0x6   : > { %142 = sbr.rel (%p139_p2) target bundleno = 59 (0x3b), region = 32  ;;  %p163_p3 = scmp.lt.s32.totalorder (!%p139_p2), %s569_s14, 63  ;;  %v881_v9 = vld [vmem:[%s987_s2] ss:$0 sm:$0xff] (!%p139_p2) }
   0xd   : > { %s990_s14 = smov (!%p163_p3, %s569_s14), 63 }
   0xe   : > { %s570_s15 = sshll.u32 %s990_s14, 2 }
   0xf   : > { %s867_s18 = scalar_lea.vmem %s985_s0, %s570_s15  ;;  %s906_s25 = scalar_lea.vmem %s988_s3, %s570_s15 }
  0x10   : > { %v642_v1 = vld [vmem:[%s867_s18] sm:$0xff]   ;;  %v785_v2 = vld [vmem:[%s867_s18 + $0x8] sm:$0xff]   ;;  %v786_v3 = vld [vmem:[%s867_s18 + $0x10] sm:$0xff]  }
  0x11   : > { %v643_v4 = vunpack.c.l.bf16 %v642_v1  ;;  %v644_v5 = vunpack.c.h.bf16 %v642_v1  ;;  %v647_v6 = vunpack.c.l.bf16 %v785_v2  ;;  %v648_v7 = vunpack.c.h.bf16 %v785_v2  ;;  %v787_v8 = vld [vmem:[%s867_s18 + $0x18] sm:$0xff]   ;;  %v788_v30 = vld [vmem:[%s867_s18 + $0x20] sm:$0xff]   ;;  %v789_v35 = vld [vmem:[%s867_s18 + $0x28] sm:$0xff]  }
  0x12   : > { %v651_v10 = vunpack.c.l.bf16 %v786_v3  ;;  %v652_v11 = vunpack.c.h.bf16 %v786_v3  ;;  %v655_v12 = vunpack.c.l.bf16 %v787_v8  ;;  %v656_v13 = vunpack.c.h.bf16 %v787_v8  ;;  %v790_v40 = vld [vmem:[%s867_s18 + $0x30] sm:$0xff]   ;;  %v791_v45 = vld [vmem:[%s867_s18 + $0x38] sm:$0xff]   ;;  %v792_v3 = vld [vmem:[%s867_s18 + $0x40] sm:$0xff]  }
  0x13   : > { %v245_v14 = vmul.f32 %v643_v4, %v872_v0  ;;  %v246_v15 = vmul.f32 %v644_v5, %v872_v0  ;;  %v247_v16 = vmul.f32 %v647_v6, %v872_v0  ;;  %v248_v17 = vmul.f32 %v648_v7, %v872_v0 }
  0x14   : > { %v249_v18 = vmul.f32 %v651_v10, %v872_v0  ;;  %v250_v19 = vmul.f32 %v652_v11, %v872_v0  ;;  %v251_v20 = vmul.f32 %v655_v12, %v872_v0  ;;  %v252_v21 = vmul.f32 %v656_v13, %v872_v0  ;;  %v793_v13 = vld [vmem:[%s867_s18 + $0x48] sm:$0xff]  }
  0x15   : > { %v284_v22 = vadd.f32 %v881_v9, %v245_v14  ;;  %v285_v23 = vadd.f32 %v881_v9, %v246_v15  ;;  %v286_v24 = vadd.f32 %v881_v9, %v247_v16  ;;  %v287_v25 = vadd.f32 %v881_v9, %v248_v17 }
  0x16   : > { %v288_v26 = vadd.f32 %v881_v9, %v249_v18  ;;  %v289_v27 = vadd.f32 %v881_v9, %v250_v19  ;;  %v290_v28 = vadd.f32 %v881_v9, %v251_v20  ;;  %v291_v29 = vadd.f32 %v881_v9, %v252_v21  ;;  %v794_v18 = vld [vmem:[%s867_s18 + $0x50] sm:$0xff]  }
  0x17   : > { %v316_v31 = vmax.f32 %v284_v22, 0.0  ;;  %v317_v32 = vmax.f32 %v285_v23, 0.0  ;;  %v318_v33 = vmax.f32 %v286_v24, 0.0  ;;  %v319_v34 = vmax.f32 %v287_v25, 0.0  ;;  %v795_v23 = vld [vmem:[%s867_s18 + $0x58] sm:$0xff]  }
  0x18   : > { %v320_v36 = vmax.f32 %v288_v26, 0.0  ;;  %v321_v37 = vmax.f32 %v289_v27, 0.0  ;;  %v322_v38 = vmax.f32 %v290_v28, 0.0  ;;  %v323_v39 = vmax.f32 %v291_v29, 0.0 }
  0x19   : > { %v708_v41 = vpack.c.bf16 %v317_v32, %v316_v31  ;;  %v713_v42 = vpack.c.bf16 %v319_v34, %v318_v33  ;;  %v659_v43 = vunpack.c.l.bf16 %v788_v30  ;;  %v660_v44 = vunpack.c.h.bf16 %v788_v30 }
  0x1a   : > { %v718_v46 = vpack.c.bf16 %v321_v37, %v320_v36  ;;  %v723_v47 = vpack.c.bf16 %v323_v39, %v322_v38  ;;  %v663_v48 = vunpack.c.l.bf16 %v789_v35  ;;  %v664_v49 = vunpack.c.h.bf16 %v789_v35 }
  0x1b   : > { %709 = vst [vmem:[%s906_s25] sm:$0xff] %v708_v41   ;;  %800 = vst [vmem:[%s906_s25 + $0x8] sm:$0xff] %v713_v42   ;;  %v253_v50 = vmul.f32 %v659_v43, %v872_v0  ;;  %v254_v51 = vmul.f32 %v660_v44, %v872_v0  ;;  %v667_v52 = vunpack.c.l.bf16 %v790_v40  ;;  %v668_v53 = vunpack.c.h.bf16 %v790_v40  ;;  %v796_v40 = vld [vmem:[%s867_s18 + $0x60] sm:$0xff]  }
  0x1c   : > { %801 = vst [vmem:[%s906_s25 + $0x10] sm:$0xff] %v718_v46   ;;  %802 = vst [vmem:[%s906_s25 + $0x18] sm:$0xff] %v723_v47   ;;  %v255_v54 = vmul.f32 %v663_v48, %v872_v0  ;;  %v256_v55 = vmul.f32 %v664_v49, %v872_v0  ;;  %v671_v56 = vunpack.c.l.bf16 %v791_v45  ;;  %v672_v57 = vunpack.c.h.bf16 %v791_v45 }
  0x1d   : > { %v292_v58 = vadd.f32 %v881_v9, %v253_v50  ;;  %v293_v59 = vadd.f32 %v881_v9, %v254_v51  ;;  %v257_v60 = vmul.f32 %v667_v52, %v872_v0  ;;  %v258_v61 = vmul.f32 %v668_v53, %v872_v0  ;;  %v797_v53 = vld [vmem:[%s867_s18 + $0x68] sm:$0xff]  }
  0x1e   : > { %v294_v62 = vadd.f32 %v881_v9, %v255_v54  ;;  %v295_v63 = vadd.f32 %v881_v9, %v256_v55  ;;  %v259_v1 = vmul.f32 %v671_v56, %v872_v0  ;;  %v260_v2 = vmul.f32 %v672_v57, %v872_v0 }
  0x1f   : > { %v324_v4 = vmax.f32 %v292_v58, 0.0  ;;  %v325_v5 = vmax.f32 %v293_v59, 0.0  ;;  %v296_v6 = vadd.f32 %v881_v9, %v257_v60  ;;  %v297_v7 = vadd.f32 %v881_v9, %v258_v61  ;;  %v798_v58 = vld [vmem:[%s867_s18 + $0x70] sm:$0xff]  }
  0x20   : > { %v326_v8 = vmax.f32 %v294_v62, 0.0  ;;  %v327_v10 = vmax.f32 %v295_v63, 0.0  ;;  %v298_v11 = vadd.f32 %v881_v9, %v259_v1  ;;  %v299_v12 = vadd.f32 %v881_v9, %v260_v2  ;;  %v799_v63 = vld [vmem:[%s867_s18 + $0x78] sm:$0xff]  }
  0x21   : > { %v728_v14 = vpack.c.bf16 %v325_v5, %v324_v4  ;;  %v328_v15 = vmax.f32 %v296_v6, 0.0  ;;  %v329_v16 = vmax.f32 %v297_v7, 0.0  ;;  %v675_v17 = vunpack.c.l.bf16 %v792_v3 }
  0x22   : > { %v733_v19 = vpack.c.bf16 %v327_v10, %v326_v8  ;;  %v330_v20 = vmax.f32 %v298_v11, 0.0  ;;  %v331_v21 = vmax.f32 %v299_v12, 0.0  ;;  %v676_v22 = vunpack.c.h.bf16 %v792_v3 }
  0x23   : > { %803 = vst [vmem:[%s906_s25 + $0x20] sm:$0xff] %v728_v14   ;;  %v738_v24 = vpack.c.bf16 %v329_v16, %v328_v15  ;;  %v261_v25 = vmul.f32 %v675_v17, %v872_v0  ;;  %v679_v26 = vunpack.c.l.bf16 %v793_v13  ;;  %v680_v27 = vunpack.c.h.bf16 %v793_v13 }
  0x24   : > { %804 = vst [vmem:[%s906_s25 + $0x28] sm:$0xff] %v733_v19   ;;  %v743_v28 = vpack.c.bf16 %v331_v21, %v330_v20  ;;  %v262_v29 = vmul.f32 %v676_v22, %v872_v0  ;;  %v683_v30 = vunpack.c.l.bf16 %v794_v18  ;;  %v684_v31 = vunpack.c.h.bf16 %v794_v18 }
  0x25   : > { %805 = vst [vmem:[%s906_s25 + $0x30] sm:$0xff] %v738_v24   ;;  %v300_v32 = vadd.f32 %v881_v9, %v261_v25  ;;  %v263_v33 = vmul.f32 %v679_v26, %v872_v0  ;;  %v264_v34 = vmul.f32 %v680_v27, %v872_v0  ;;  %v687_v35 = vunpack.c.l.bf16 %v795_v23 }
  0x26   : > { %806 = vst [vmem:[%s906_s25 + $0x38] sm:$0xff] %v743_v28   ;;  %v301_v36 = vadd.f32 %v881_v9, %v262_v29  ;;  %v265_v37 = vmul.f32 %v683_v30, %v872_v0  ;;  %v266_v38 = vmul.f32 %v684_v31, %v872_v0  ;;  %v688_v39 = vunpack.c.h.bf16 %v795_v23 }
  0x27   : > { %v332_v41 = vmax.f32 %v300_v32, 0.0  ;;  %v302_v42 = vadd.f32 %v881_v9, %v263_v33  ;;  %v303_v43 = vadd.f32 %v881_v9, %v264_v34  ;;  %v267_v44 = vmul.f32 %v687_v35, %v872_v0 }
  0x28   : > { %v333_v45 = vmax.f32 %v301_v36, 0.0  ;;  %v304_v46 = vadd.f32 %v881_v9, %v265_v37  ;;  %v305_v47 = vadd.f32 %v881_v9, %v266_v38  ;;  %v268_v48 = vmul.f32 %v688_v39, %v872_v0 }
  0x29   : > { %v334_v49 = vmax.f32 %v302_v42, 0.0  ;;  %v335_v50 = vmax.f32 %v303_v43, 0.0  ;;  %v306_v51 = vadd.f32 %v881_v9, %v267_v44  ;;  %v691_v52 = vunpack.c.l.bf16 %v796_v40 }
  0x2a   : > { %v748_v54 = vpack.c.bf16 %v333_v45, %v332_v41  ;;  %v336_v55 = vmax.f32 %v304_v46, 0.0  ;;  %v337_v56 = vmax.f32 %v305_v47, 0.0  ;;  %v307_v57 = vadd.f32 %v881_v9, %v268_v48 }
  0x2b   : > { %v753_v59 = vpack.c.bf16 %v335_v50, %v334_v49  ;;  %v338_v60 = vmax.f32 %v306_v51, 0.0  ;;  %v692_v61 = vunpack.c.h.bf16 %v796_v40  ;;  %v269_v62 = vmul.f32 %v691_v52, %v872_v0 }
  0x2c   : > { %807 = vst [vmem:[%s906_s25 + $0x40] sm:$0xff] %v748_v54   ;;  %v758_v1 = vpack.c.bf16 %v337_v56, %v336_v55  ;;  %v339_v2 = vmax.f32 %v307_v57, 0.0  ;;  %v695_v3 = vunpack.c.l.bf16 %v797_v53  ;;  %v696_v4 = vunpack.c.h.bf16 %v797_v53 }
  0x2d   : > { %808 = vst [vmem:[%s906_s25 + $0x48] sm:$0xff] %v753_v59   ;;  %v270_v5 = vmul.f32 %v692_v61, %v872_v0  ;;  %v308_v6 = vadd.f32 %v881_v9, %v269_v62  ;;  %v699_v7 = vunpack.c.l.bf16 %v798_v58  ;;  %v700_v8 = vunpack.c.h.bf16 %v798_v58 }
  0x2e   : > { %809 = vst [vmem:[%s906_s25 + $0x50] sm:$0xff] %v758_v1   ;;  %v763_v10 = vpack.c.bf16 %v339_v2, %v338_v60  ;;  %v271_v11 = vmul.f32 %v695_v3, %v872_v0  ;;  %v272_v12 = vmul.f32 %v696_v4, %v872_v0  ;;  %v703_v13 = vunpack.c.l.bf16 %v799_v63 }
  0x2f   : > { %v309_v14 = vadd.f32 %v881_v9, %v270_v5  ;;  %v340_v15 = vmax.f32 %v308_v6, 0.0  ;;  %v273_v16 = vmul.f32 %v699_v7, %v872_v0  ;;  %v274_v17 = vmul.f32 %v700_v8, %v872_v0 }
  0x30   : > { %810 = vst [vmem:[%s906_s25 + $0x58] sm:$0xff] %v763_v10   ;;  %v310_v18 = vadd.f32 %v881_v9, %v271_v11  ;;  %v311_v19 = vadd.f32 %v881_v9, %v272_v12  ;;  %v704_v20 = vunpack.c.h.bf16 %v799_v63  ;;  %v275_v21 = vmul.f32 %v703_v13, %v872_v0 }
  0x31   : > { %v341_v22 = vmax.f32 %v309_v14, 0.0  ;;  %v312_v23 = vadd.f32 %v881_v9, %v273_v16  ;;  %v313_v24 = vadd.f32 %v881_v9, %v274_v17 }
  0x32   : > { %v342_v25 = vmax.f32 %v310_v18, 0.0  ;;  %v343_v26 = vmax.f32 %v311_v19, 0.0  ;;  %v276_v27 = vmul.f32 %v704_v20, %v872_v0  ;;  %v314_v28 = vadd.f32 %v881_v9, %v275_v21 }
  0x33   : > { %v768_v29 = vpack.c.bf16 %v341_v22, %v340_v15  ;;  %v344_v30 = vmax.f32 %v312_v23, 0.0  ;;  %v345_v31 = vmax.f32 %v313_v24, 0.0 }
  0x34   : > { %v773_v32 = vpack.c.bf16 %v343_v26, %v342_v25  ;;  %v315_v33 = vadd.f32 %v881_v9, %v276_v27  ;;  %v346_v34 = vmax.f32 %v314_v28, 0.0 }
  0x35   : > { %811 = vst [vmem:[%s906_s25 + $0x60] sm:$0xff] %v768_v29   ;;  %v778_v35 = vpack.c.bf16 %v345_v31, %v344_v30 }
  0x36   : > { %812 = vst [vmem:[%s906_s25 + $0x68] sm:$0xff] %v773_v32   ;;  %v347_v36 = vmax.f32 %v315_v33, 0.0 }
  0x37   : > { %813 = vst [vmem:[%s906_s25 + $0x70] sm:$0xff] %v778_v35  }
  0x38   : > { %v783_v37 = vpack.c.bf16 %v347_v36, %v346_v34 }
  0x3a   : > { %814 = vst [vmem:[%s906_s25 + $0x78] sm:$0xff] %v783_v37  }
  0x3b PF: > { %s13_s12 = sadd.s32 1, %s829_s12  }
  0x3c   : > { %p10_p4 = scmp.ge.s32.totalorder %s13_s12, 4  }
  0x3e   :  { %12 = sbr.rel (!%p10_p4) target bundleno = 1 (0x1), region = 62 }

</bundles_post_ra>
